<compile_context>
chip_gen: v7x
topology: tpu7x:2x2x1
jax: 0.10.0
libtpu: 0.0.40
codegen_flags: <defaults>
</compile_context>

<pallas_src>
import functools
import math

import numpy as np
import jax
import jax.numpy as jnp
from jax import lax
from jax.experimental import pallas as pl
from jax.experimental.pallas import tpu as pltpu


def _round_up(x, m):
    return ((x + m - 1) // m) * m


# ---------------------------------------------------------------------------
# Fused FeedForwardBlock (+ residual): out = x + Linear1(GELU(Linear0(LN(x))))
# ---------------------------------------------------------------------------
def _ffn_block_kernel(x_ref, gamma_ref, beta_ref, w0_ref, b0_ref, w1_ref,
                      b1_ref, o_ref, xn_ref, acc_ref, *, eps, inv_n,
                      approximate_gelu):
    h_idx = pl.program_id(1)

    @pl.when(h_idx == 0)
    def _():
        # LayerNorm (padding-safe one-pass moments: padded feature cols are 0).
        x = x_ref[...].astype(jnp.float32)
        mean = jnp.sum(x, axis=-1, keepdims=True) * inv_n
        mean_sq = jnp.sum(x * x, axis=-1, keepdims=True) * inv_n
        var = mean_sq - mean * mean
        xn = (x - mean) * lax.rsqrt(var + eps)
        xn = xn * gamma_ref[...] + beta_ref[...]
        xn_ref[...] = xn.astype(xn_ref.dtype)        # bf16 matmul operand
        acc_ref[...] = jnp.zeros_like(acc_ref)

    # Linear 0 chunk: (tm, E) @ (E, th) -> f32
    h = jnp.dot(xn_ref[...], w0_ref[...], preferred_element_type=jnp.float32)
    h = h + b0_ref[...]
    if approximate_gelu:
        h = jax.nn.gelu(h, approximate=True)         # tanh form -> EUP
    else:
        # exact erf GELU (matches nn.GELU() default)
        h = 0.5 * h * (1.0 + lax.erf(h * jnp.float32(0.7071067811865476)))
    # Linear 1 chunk: (tm, th) @ (th, E), accumulate in f32 scratch.
    acc_ref[...] += jnp.dot(h.astype(w1_ref.dtype), w1_ref[...],
                            preferred_element_type=jnp.float32)

    @pl.when(h_idx == pl.num_programs(1) - 1)
    def _():
        y = acc_ref[...] + b1_ref[...]
        # Dropout: identity in eval mode. Residual fused here.
        o_ref[...] = (x_ref[...].astype(jnp.float32) + y).astype(o_ref.dtype)


def feed_forward_block(x, gamma, beta, w0, b0, w1, b1, *, eps=1e-5, tm=256,
                       th=512, approximate_gelu=False):
    """x: (B, S, E) f32.  w0: (E, H), w1: (H, E) in (in, out) layout.
    Returns x + FFN(LN(x))."""
    B, S, E = x.shape
    H = w0.shape[1]
    rows = B * S

    E_p = _round_up(E, 128)
    tm_eff = min(_round_up(tm, 8), _round_up(rows, 8))
    rows_p = _round_up(rows, tm_eff)
    th_eff = min(_round_up(th, 128), _round_up(H, 128))
    H_p = _round_up(H, th_eff)

    x2 = jnp.pad(x.reshape(rows, E), ((0, rows_p - rows), (0, E_p - E)))
    gamma2 = jnp.pad(gamma, (0, E_p - E)).reshape(1, E_p)
    beta2 = jnp.pad(beta, (0, E_p - E)).reshape(1, E_p)
    w0p = jnp.pad(w0, ((0, E_p - E), (0, H_p - H))).astype(jnp.bfloat16)
    b0p = jnp.pad(b0, (0, H_p - H)).reshape(1, H_p)
    w1p = jnp.pad(w1, ((0, H_p - H), (0, E_p - E))).astype(jnp.bfloat16)
    b1p = jnp.pad(b1, (0, E_p - E)).reshape(1, E_p)

    grid = (rows_p // tm_eff, H_p // th_eff)

    # Explicit VMEM budget: double-buffered x/out tiles + bf16 weight chunks
    # + scratch; capped well below v7x's 64 MiB per-core VMEM.
    vmem_est = (4 * tm_eff * E_p * 4
                + 2 * 2 * (E_p * th_eff + th_eff * E_p)
                + 2 * 4 * (3 * E_p + th_eff)
                + tm_eff * E_p * (2 + 4)
                + (2 << 20))
    vmem_limit = int(min(48 << 20, max(16 << 20, vmem_est)))

    cost = pl.CostEstimate(
        flops=2 * 2 * rows_p * E_p * H_p,
        transcendentals=rows_p * H_p,
        bytes_accessed=2 * rows_p * E_p * 4 + 2 * E_p * H_p * 2 * grid[0])

    out = pl.pallas_call(
        functools.partial(_ffn_block_kernel, eps=eps, inv_n=1.0 / E,
                          approximate_gelu=approximate_gelu),
        out_shape=jax.ShapeDtypeStruct((rows_p, E_p), x.dtype),
        grid_spec=pltpu.PrefetchScalarGridSpec(
            num_scalar_prefetch=0,
            grid=grid,
            in_specs=[
                pl.BlockSpec((tm_eff, E_p), lambda i, h: (i, 0)),    # x rows
                pl.BlockSpec((1, E_p), lambda i, h: (0, 0)),         # gamma
                pl.BlockSpec((1, E_p), lambda i, h: (0, 0)),         # beta
                pl.BlockSpec((E_p, th_eff), lambda i, h: (0, h)),    # w0 chunk
                pl.BlockSpec((1, th_eff), lambda i, h: (0, h)),      # b0 chunk
                pl.BlockSpec((th_eff, E_p), lambda i, h: (h, 0)),    # w1 chunk
                pl.BlockSpec((1, E_p), lambda i, h: (0, 0)),         # b1
            ],
            out_specs=pl.BlockSpec((tm_eff, E_p), lambda i, h: (i, 0)),
            scratch_shapes=[
                pltpu.VMEM((tm_eff, E_p), jnp.bfloat16),   # LN output (reused)
                pltpu.VMEM((tm_eff, E_p), jnp.float32),    # f32 accumulator
            ]),
        compiler_params=pltpu.CompilerParams(
            dimension_semantics=("parallel", "arbitrary"),
            vmem_limit_bytes=vmem_limit),
        cost_estimate=cost,
    )(x2, gamma2, beta2, w0p, b0p, w1p, b1p)

    return out[:rows, :E].reshape(B, S, E)


# ---------------------------------------------------------------------------
# Fused MultiHeadAttentionBlock (+ residual): out = x + OutProj(MHA(LN(x)))
# ---------------------------------------------------------------------------
def _attn_block_kernel(x_ref, gamma_ref, beta_ref, wqkv_ref, bqkv_ref, wo_ref,
                       bo_ref, o_ref, *, eps, inv_n, n_heads, head_dim, e_real,
                       e_pad, scale):
    x = x_ref[0].astype(jnp.float32)                       # (S_p, E_p)

    mean = jnp.sum(x, axis=-1, keepdims=True) * inv_n
    mean_sq = jnp.sum(x * x, axis=-1, keepdims=True) * inv_n
    var = mean_sq - mean * mean
    xn = (x - mean) * lax.rsqrt(var + eps)
    xn = xn * gamma_ref[...] + beta_ref[...]

    # Fused QKV projection (bf16 operands, f32 accumulation).
    qkv = jnp.dot(xn.astype(jnp.bfloat16), wqkv_ref[...],
                  preferred_element_type=jnp.float32) + bqkv_ref[...]
    q = qkv[:, :e_pad]
    k = qkv[:, e_pad:2 * e_pad]
    v = qkv[:, 2 * e_pad:]

    s_p = x.shape[0]
    row = lax.broadcasted_iota(jnp.int32, (s_p, s_p), 0)
    col = lax.broadcasted_iota(jnp.int32, (s_p, s_p), 1)
    causal = col <= row

    ctx_parts = []
    for hh in range(n_heads):                              # static head loop
        lo = hh * head_dim
        hi = lo + head_dim
        qh = q[:, lo:hi].astype(jnp.bfloat16)
        kh = k[:, lo:hi].astype(jnp.bfloat16)
        vh = v[:, lo:hi].astype(jnp.bfloat16)
        scores = jnp.dot(qh, kh.T, preferred_element_type=jnp.float32) * scale
        scores = jnp.where(causal, scores, jnp.float32(-1e30))
        scores = scores - jnp.max(scores, axis=-1, keepdims=True)
        probs = jnp.exp(scores)
        probs = probs / jnp.sum(probs, axis=-1, keepdims=True)
        # attention dropout: identity in eval mode
        ctx_parts.append(jnp.dot(probs.astype(jnp.bfloat16), vh,
                                 preferred_element_type=jnp.float32))
    if e_pad > e_real:
        ctx_parts.append(jnp.zeros((s_p, e_pad - e_real), jnp.float32))
    ctx = jnp.concatenate(ctx_parts, axis=-1)              # (S_p, E_p)

    out = jnp.dot(ctx.astype(jnp.bfloat16), wo_ref[...],
                  preferred_element_type=jnp.float32) + bo_ref[...]
    o_ref[0] = (x + out).astype(o_ref.dtype)               # residual fused


def attention_block(x, gamma, beta, wq, wk, wv, bq, bk, bv, wo, bo, *,
                    n_heads, eps=1e-5):
    """x: (B, S, E).  Weights in (in, out) layout.  Returns x + MHA(LN(x))."""
    B, S, E = x.shape
    assert E % n_heads == 0
    head_dim = E // n_heads
    E_p = _round_up(E, 128)
    S_p = _round_up(S, 8)

    xp = jnp.pad(x, ((0, 0), (0, S_p - S), (0, E_p - E)))
    gamma2 = jnp.pad(gamma, (0, E_p - E)).reshape(1, E_p)
    beta2 = jnp.pad(beta, (0, E_p - E)).reshape(1, E_p)

    def pad_w(w):
        return jnp.pad(w, ((0, E_p - E), (0, E_p - E)))

    wqkv = jnp.concatenate([pad_w(wq), pad_w(wk), pad_w(wv)],
                           axis=1).astype(jnp.bfloat16)
    bqkv = jnp.concatenate([jnp.pad(bq, (0, E_p - E)),
                            jnp.pad(bk, (0, E_p - E)),
                            jnp.pad(bv, (0, E_p - E))]).reshape(1, 3 * E_p)
    wop = pad_w(wo).astype(jnp.bfloat16)
    bop = jnp.pad(bo, (0, E_p - E)).reshape(1, E_p)

    cost = pl.CostEstimate(
        flops=B * (2 * S_p * E_p * 3 * E_p + 4 * S_p * S_p * E
                   + 2 * S_p * E_p * E_p),
        transcendentals=B * n_heads * S_p * S_p,
        bytes_accessed=2 * B * S_p * E_p * 4 + 4 * E_p * E_p * 2)

    vmem_est = (4 * S_p * E_p * 4
                + 2 * 2 * (3 * E_p * E_p + E_p * E_p)
                + (2 << 20))
    vmem_limit = int(min(48 << 20, max(16 << 20, vmem_est)))

    out = pl.pallas_call(
        functools.partial(_attn_block_kernel, eps=eps, inv_n=1.0 / E,
                          n_heads=n_heads, head_dim=head_dim, e_real=E,
                          e_pad=E_p, scale=1.0 / math.sqrt(head_dim)),
        out_shape=jax.ShapeDtypeStruct((B, S_p, E_p), x.dtype),
        grid_spec=pltpu.PrefetchScalarGridSpec(
            num_scalar_prefetch=0,
            grid=(B,),
            in_specs=[
                pl.BlockSpec((1, S_p, E_p), lambda b: (b, 0, 0)),   # x
                pl.BlockSpec((1, E_p), lambda b: (0, 0)),           # gamma
                pl.BlockSpec((1, E_p), lambda b: (0, 0)),           # beta
                pl.BlockSpec((E_p, 3 * E_p), lambda b: (0, 0)),     # wqkv
                pl.BlockSpec((1, 3 * E_p), lambda b: (0, 0)),       # bqkv
                pl.BlockSpec((E_p, E_p), lambda b: (0, 0)),         # wo
                pl.BlockSpec((1, E_p), lambda b: (0, 0)),           # bo
            ],
            out_specs=pl.BlockSpec((1, S_p, E_p), lambda b: (b, 0, 0)),
        ),
        compiler_params=pltpu.CompilerParams(
            dimension_semantics=("parallel",),
            vmem_limit_bytes=vmem_limit),
        cost_estimate=cost,
    )(xp, gamma2, beta2, wqkv, bqkv, wop, bop)

    return out[:, :S, :E]


# ---------------------------------------------------------------------------
# Plain-JAX pieces (data-dependent gathers): adaptive + positional embeddings
# ---------------------------------------------------------------------------
def adaptive_embedding(indices, tables, mappings, cutoffs_ext, n_embeddings):
    out = jnp.zeros(indices.shape + (n_embeddings,), jnp.float32)
    for ii in range(len(tables)):
        lo, hi = cutoffs_ext[ii], cutoffs_ext[ii + 1]
        mask = jnp.logical_and(indices >= lo, indices < hi)
        rel = jnp.clip(indices - lo, 0, tables[ii].shape[0] - 1)
        emb = tables[ii][rel]                      # (B, S, d_ii) gather
        emb = emb @ mappings[ii]                   # (d_ii, E) projection
        out = jnp.where(mask[..., None], emb, out)
    return out


def positional_table(n_embeddings, n_tokens):
    ii = np.arange(n_embeddings, dtype=np.float64)
    pos = np.arange(n_tokens, dtype=np.float64)
    theta = pos[:, None] / np.power(10000.0, 2.0 * ii[None, :] / n_embeddings)
    theta[:, 0::2] = np.sin(theta[:, 0::2])
    theta[:, 1::2] = np.cos(theta[:, 1::2])
    return jnp.asarray(theta, dtype=jnp.float32)


# ---------------------------------------------------------------------------
# Pure-JAX reference (mirrors the kernel's bf16 matmul operands) for checking
# ---------------------------------------------------------------------------
def _layer_norm_ref(x, gamma, beta, eps=1e-5):
    mean = jnp.mean(x, axis=-1, keepdims=True)
    var = jnp.mean(jnp.square(x - mean), axis=-1, keepdims=True)
    return (x - mean) * lax.rsqrt(var + eps) * gamma + beta


def _bf16_dot(a, b):
    return jnp.dot(a.astype(jnp.bfloat16), b.astype(jnp.bfloat16),
                   preferred_element_type=jnp.float32)


def _attention_block_ref(x, p, *, n_heads, eps=1e-5):
    B, S, E = x.shape
    dh = E // n_heads
    xn = _layer_norm_ref(x, p["gamma"], p["beta"], eps)
    q = _bf16_dot(xn, p["wq"]) + p["bq"]
    k = _bf16_dot(xn, p["wk"]) + p["bk"]
    v = _bf16_dot(xn, p["wv"]) + p["bv"]
    q = q.reshape(B, S, n_heads, dh).transpose(0, 2, 1, 3)
    k = k.reshape(B, S, n_heads, dh).transpose(0, 2, 1, 3)
    v = v.reshape(B, S, n_heads, dh).transpose(0, 2, 1, 3)
    scores = jnp.einsum("bhqd,bhkd->bhqk", q.astype(jnp.bfloat16),
                        k.astype(jnp.bfloat16),
                        preferred_element_type=jnp.float32) * (1.0 / math.sqrt(dh))
    causal = jnp.tril(jnp.ones((S, S), bool))
    scores = jnp.where(causal, scores, jnp.float32(-1e30))
    scores = scores - jnp.max(scores, axis=-1, keepdims=True)
    probs = jnp.exp(scores)
    probs = probs / jnp.sum(probs, axis=-1, keepdims=True)
    ctx = jnp.einsum("bhqk,bhkd->bhqd", probs.astype(jnp.bfloat16),
                     v.astype(jnp.bfloat16), preferred_element_type=jnp.float32)
    ctx = ctx.transpose(0, 2, 1, 3).reshape(B, S, E)
    out = _bf16_dot(ctx, p["wo"]) + p["bo"]
    return x + out


def _ffn_block_ref(x, p, eps=1e-5):
    xn = _layer_norm_ref(x, p["gamma"], p["beta"], eps)
    h = _bf16_dot(xn, p["w0"]) + p["b0"]
    h = 0.5 * h * (1.0 + lax.erf(h * jnp.float32(0.7071067811865476)))
    y = _bf16_dot(h, p["w1"]) + p["b1"]
    return x + y


# ---------------------------------------------------------------------------
# Full forward (embedding + positional + transformer blocks)
# ---------------------------------------------------------------------------
def transformer_forward_no_softmax(tokens, params, *, n_heads, use_pallas=True):
    _, S = tokens.shape
    x = adaptive_embedding(tokens, params["emb_tables"], params["emb_mappings"],
                           params["cutoffs_ext"], params["n_embeddings"])
    x = x + params["pos_table"][:S][None, :, :]
    for blk in params["blocks"]:
        a, f = blk["attn"], blk["ffn"]
        if use_pallas:
            x = attention_block(x, a["gamma"], a["beta"], a["wq"], a["wk"],
                                a["wv"], a["bq"], a["bk"], a["bv"], a["wo"],
                                a["bo"], n_heads=n_heads)
            x = feed_forward_block(x, f["gamma"], f["beta"], f["w0"], f["b0"],
                                   f["w1"], f["b1"])
        else:
            x = _attention_block_ref(x, a, n_heads=n_heads)
            x = _ffn_block_ref(x, f)
    # TODO(synk): AdaptiveLogSoftmaxWithLoss (outputs, loss) head not implemented.
    return x


if __name__ == "__main__":
    # Small shapes consistent with the module (scaled-down Transformer).
    n_classes, cutoffs = 100, [20, 60]
    n_blocks, n_heads = 2, 2
    B, S, E = 2, 8, 128
    H = 4 * E
    reduction_factor = 4

    key = jax.random.PRNGKey(0)
    keys = iter(jax.random.split(key, 64))

    def nrm(k, shape, std):
        return std * jax.random.normal(k, shape, dtype=jnp.float32)

    cutoffs_ext = [0] + list(cutoffs) + [n_classes]
    emb_tables, emb_mappings = [], []
    d = E
    for ii in range(len(cutoffs_ext) - 1):
        count = cutoffs_ext[ii + 1] - cutoffs_ext[ii]
        emb_tables.append(nrm(next(keys), (count, d), 0.1))
        emb_mappings.append(nrm(next(keys), (d, E), 1.0 / math.sqrt(d)))
        d = d // reduction_factor

    blocks = []
    for _ in range(n_blocks):
        attn = dict(
            gamma=1.0 + nrm(next(keys), (E,), 0.05),
            beta=nrm(next(keys), (E,), 0.05),
            wq=nrm(next(keys), (E, E), 0.05), bq=nrm(next(keys), (E,), 0.01),
            wk=nrm(next(keys), (E, E), 0.05), bk=nrm(next(keys), (E,), 0.01),
            wv=nrm(next(keys), (E, E), 0.05), bv=nrm(next(keys), (E,), 0.01),
            wo=nrm(next(keys), (E, E), 0.05), bo=nrm(next(keys), (E,), 0.01),
        )
        ffn = dict(
            gamma=1.0 + nrm(next(keys), (E,), 0.05),
            beta=nrm(next(keys), (E,), 0.05),
            w0=nrm(next(keys), (E, H), 0.05), b0=nrm(next(keys), (H,), 0.01),
            w1=nrm(next(keys), (H, E), 0.03), b1=nrm(next(keys), (E,), 0.01),
        )
        blocks.append(dict(attn=attn, ffn=ffn))

    params = dict(emb_tables=emb_tables, emb_mappings=emb_mappings,
                  cutoffs_ext=cutoffs_ext, n_embeddings=E,
                  pos_table=positional_table(E, S), blocks=blocks)

    tokens = jax.random.randint(next(keys), (B, S), 0, n_classes,
                                dtype=jnp.int32)

    out = transformer_forward_no_softmax(tokens, params, n_heads=n_heads,
                                         use_pallas=True)
    out = jax.block_until_ready(out)

    ref = transformer_forward_no_softmax(tokens, params, n_heads=n_heads,
                                         use_pallas=False)
    ref = jax.block_until_ready(ref)

    assert out.shape == (B, S, E)
    assert bool(jnp.all(jnp.isfinite(out)))
    max_err = float(jnp.max(jnp.abs(out - ref)))
    assert jnp.allclose(out, ref, atol=1e-2, rtol=1e-2), max_err

    print("KERNEL_OK")
</pallas_src>

<mosaic_0001>
module attributes {stable_mosaic.version = 11 : i64} {
  func.func @_attn_block_kernel(%arg0: i32, %arg1: memref<1x8x128xf32, #tpu.memory_space<vmem>>, %arg2: memref<1x128xf32, #tpu.memory_space<vmem>>, %arg3: memref<1x128xf32, #tpu.memory_space<vmem>>, %arg4: memref<128x384xbf16, #tpu.memory_space<vmem>>, %arg5: memref<1x384xf32, #tpu.memory_space<vmem>>, %arg6: memref<128x128xbf16, #tpu.memory_space<vmem>>, %arg7: memref<1x128xf32, #tpu.memory_space<vmem>>, %arg8: memref<1x8x128xf32, #tpu.memory_space<vmem>>) attributes {dimension_semantics = [#tpu.dimension_semantics<parallel>], iteration_bounds = array<i64: 2>, scalar_prefetch = 0 : i64, scratch_operands = 0 : i64, tpu.core_type = #tpu.core_type<tc>, window_params = [{transform_indices = @transform_0, window_bounds = array<i64: 1, 8, 128>}, {pipeline_mode = #tpu.pipeline_mode<synchronous>, transform_indices = @transform_1, window_bounds = array<i64: 1, 128>}, {pipeline_mode = #tpu.pipeline_mode<synchronous>, transform_indices = @transform_2, window_bounds = array<i64: 1, 128>}, {pipeline_mode = #tpu.pipeline_mode<synchronous>, transform_indices = @transform_3, window_bounds = array<i64: 128, 384>}, {pipeline_mode = #tpu.pipeline_mode<synchronous>, transform_indices = @transform_4, window_bounds = array<i64: 1, 384>}, {pipeline_mode = #tpu.pipeline_mode<synchronous>, transform_indices = @transform_5, window_bounds = array<i64: 128, 128>}, {pipeline_mode = #tpu.pipeline_mode<synchronous>, transform_indices = @transform_6, window_bounds = array<i64: 1, 128>}, {transform_indices = @transform_7, window_bounds = array<i64: 1, 8, 128>}]} {
    %c0 = arith.constant 0 : index
    %c0_0 = arith.constant 0 : index
    %c0_1 = arith.constant 0 : index
    %0 = vector.load %arg1[%c0, %c0_0, %c0_1] : memref<1x8x128xf32, #tpu.memory_space<vmem>>, vector<1x8x128xf32>
    %1 = vector.shape_cast %0 : vector<1x8x128xf32> to vector<8x128xf32>
    %cst = arith.constant dense<0.000000e+00> : vector<8xf32>
    %2 = vector.multi_reduction <add>, %1, %cst [1] : vector<8x128xf32> to vector<8xf32>
    %3 = vector.shape_cast %2 : vector<8xf32> to vector<8x1xf32>
    %cst_2 = arith.constant 7.812500e-03 : f32
    %4 = vector.broadcast %cst_2 : f32 to vector<8x1xf32>
    %5 = arith.mulf %3, %4 : vector<8x1xf32>
    %6 = arith.mulf %1, %1 : vector<8x128xf32>
    %cst_3 = arith.constant dense<0.000000e+00> : vector<8xf32>
    %7 = vector.multi_reduction <add>, %6, %cst_3 [1] : vector<8x128xf32> to vector<8xf32>
    %8 = vector.shape_cast %7 : vector<8xf32> to vector<8x1xf32>
    %cst_4 = arith.constant 7.812500e-03 : f32
    %9 = vector.broadcast %cst_4 : f32 to vector<8x1xf32>
    %10 = arith.mulf %8, %9 : vector<8x1xf32>
    %11 = arith.mulf %5, %5 : vector<8x1xf32>
    %12 = arith.subf %10, %11 : vector<8x1xf32>
    %13 = vector.broadcast %5 : vector<8x1xf32> to vector<8x128xf32>
    %14 = arith.subf %1, %13 : vector<8x128xf32>
    %cst_5 = arith.constant 9.99999974E-6 : f32
    %15 = vector.broadcast %cst_5 : f32 to vector<8x1xf32>
    %16 = arith.addf %12, %15 : vector<8x1xf32>
    %17 = math.rsqrt %16 : vector<8x1xf32>
    %18 = vector.broadcast %17 : vector<8x1xf32> to vector<8x128xf32>
    %19 = arith.mulf %14, %18 : vector<8x128xf32>
    %c0_6 = arith.constant 0 : index
    %c0_7 = arith.constant 0 : index
    %20 = vector.load %arg2[%c0_6, %c0_7] : memref<1x128xf32, #tpu.memory_space<vmem>>, vector<1x128xf32>
    %21 = vector.broadcast %20 : vector<1x128xf32> to vector<8x128xf32>
    %22 = arith.mulf %19, %21 : vector<8x128xf32>
    %c0_8 = arith.constant 0 : index
    %c0_9 = arith.constant 0 : index
    %23 = vector.load %arg3[%c0_8, %c0_9] : memref<1x128xf32, #tpu.memory_space<vmem>>, vector<1x128xf32>
    %24 = vector.broadcast %23 : vector<1x128xf32> to vector<8x128xf32>
    %25 = arith.addf %22, %24 : vector<8x128xf32>
    %26 = arith.truncf %25 : vector<8x128xf32> to vector<8x128xbf16>
    %c0_10 = arith.constant 0 : index
    %c0_11 = arith.constant 0 : index
    %27 = vector.load %arg4[%c0_10, %c0_11] : memref<128x384xbf16, #tpu.memory_space<vmem>>, vector<128x384xbf16>
    %cst_12 = arith.constant dense<0.000000e+00> : vector<8x384xf32>
    %28 = tpu.matmul %26, %27, %cst_12 {dimension_numbers = #tpu.dot_dimension_numbers<[1], [0], [0], [1], [0, 0, 1, 1], [], []>} : vector<8x128xbf16>, vector<128x384xbf16>, vector<8x384xf32> -> vector<8x384xf32>
    %c0_13 = arith.constant 0 : index
    %c0_14 = arith.constant 0 : index
    %29 = vector.load %arg5[%c0_13, %c0_14] : memref<1x384xf32, #tpu.memory_space<vmem>>, vector<1x384xf32>
    %30 = vector.broadcast %29 : vector<1x384xf32> to vector<8x384xf32>
    %31 = arith.addf %28, %30 : vector<8x384xf32>
    %32 = vector.extract_strided_slice %31 {offsets = [0, 0], sizes = [8, 128], strides = [1, 1]} : vector<8x384xf32> to vector<8x128xf32>
    %33 = vector.extract_strided_slice %31 {offsets = [0, 128], sizes = [8, 128], strides = [1, 1]} : vector<8x384xf32> to vector<8x128xf32>
    %34 = vector.extract_strided_slice %31 {offsets = [0, 256], sizes = [8, 128], strides = [1, 1]} : vector<8x384xf32> to vector<8x128xf32>
    %35 = tpu.iota {dimensions = array<i32: 0>} : vector<8x8xi32>
    %36 = tpu.iota {dimensions = array<i32: 1>} : vector<8x8xi32>
    %37 = arith.cmpi sle, %36, %35 : vector<8x8xi32>
    %38 = vector.extract_strided_slice %32 {offsets = [0, 0], sizes = [8, 64], strides = [1, 1]} : vector<8x128xf32> to vector<8x64xf32>
    %39 = arith.truncf %38 : vector<8x64xf32> to vector<8x64xbf16>
    %40 = vector.extract_strided_slice %33 {offsets = [0, 0], sizes = [8, 64], strides = [1, 1]} : vector<8x128xf32> to vector<8x64xf32>
    %41 = arith.truncf %40 : vector<8x64xf32> to vector<8x64xbf16>
    %42 = vector.extract_strided_slice %34 {offsets = [0, 0], sizes = [8, 64], strides = [1, 1]} : vector<8x128xf32> to vector<8x64xf32>
    %43 = arith.truncf %42 : vector<8x64xf32> to vector<8x64xbf16>
    %44 = tpu.transpose %41, [1, 0] : vector<8x64xbf16> -> vector<64x8xbf16>
    %cst_15 = arith.constant dense<0.000000e+00> : vector<8x8xf32>
    %45 = tpu.matmul %39, %44, %cst_15 {dimension_numbers = #tpu.dot_dimension_numbers<[1], [0], [0], [1], [0, 0, 1, 1], [], []>} : vector<8x64xbf16>, vector<64x8xbf16>, vector<8x8xf32> -> vector<8x8xf32>
    %cst_16 = arith.constant 1.250000e-01 : f32
    %46 = vector.broadcast %cst_16 : f32 to vector<8x8xf32>
    %47 = arith.mulf %45, %46 : vector<8x8xf32>
    %cst_17 = arith.constant -1.000000e+30 : f32
    %48 = vector.broadcast %cst_17 : f32 to vector<8x8xf32>
    %49 = arith.select %37, %47, %48 : vector<8x8xi1>, vector<8x8xf32>
    %cst_18 = arith.constant dense<0xFF800000> : vector<8xf32>
    %50 = vector.multi_reduction <maximumf>, %49, %cst_18 [1] : vector<8x8xf32> to vector<8xf32>
    %51 = vector.shape_cast %50 : vector<8xf32> to vector<8x1xf32>
    %52 = vector.broadcast %51 : vector<8x1xf32> to vector<8x8xf32>
    %53 = arith.subf %49, %52 : vector<8x8xf32>
    %54 = math.exp %53 : vector<8x8xf32>
    %cst_19 = arith.constant dense<0.000000e+00> : vector<8xf32>
    %55 = vector.multi_reduction <add>, %54, %cst_19 [1] : vector<8x8xf32> to vector<8xf32>
    %56 = vector.shape_cast %55 : vector<8xf32> to vector<8x1xf32>
    %57 = vector.broadcast %56 : vector<8x1xf32> to vector<8x8xf32>
    %58 = arith.divf %54, %57 : vector<8x8xf32>
    %59 = arith.truncf %58 : vector<8x8xf32> to vector<8x8xbf16>
    %cst_20 = arith.constant dense<0.000000e+00> : vector<8x64xf32>
    %60 = tpu.matmul %59, %43, %cst_20 {dimension_numbers = #tpu.dot_dimension_numbers<[1], [0], [0], [1], [0, 0, 1, 1], [], []>} : vector<8x8xbf16>, vector<8x64xbf16>, vector<8x64xf32> -> vector<8x64xf32>
    %61 = vector.extract_strided_slice %32 {offsets = [0, 64], sizes = [8, 64], strides = [1, 1]} : vector<8x128xf32> to vector<8x64xf32>
    %62 = arith.truncf %61 : vector<8x64xf32> to vector<8x64xbf16>
    %63 = vector.extract_strided_slice %33 {offsets = [0, 64], sizes = [8, 64], strides = [1, 1]} : vector<8x128xf32> to vector<8x64xf32>
    %64 = arith.truncf %63 : vector<8x64xf32> to vector<8x64xbf16>
    %65 = vector.extract_strided_slice %34 {offsets = [0, 64], sizes = [8, 64], strides = [1, 1]} : vector<8x128xf32> to vector<8x64xf32>
    %66 = arith.truncf %65 : vector<8x64xf32> to vector<8x64xbf16>
    %67 = tpu.transpose %64, [1, 0] : vector<8x64xbf16> -> vector<64x8xbf16>
    %cst_21 = arith.constant dense<0.000000e+00> : vector<8x8xf32>
    %68 = tpu.matmul %62, %67, %cst_21 {dimension_numbers = #tpu.dot_dimension_numbers<[1], [0], [0], [1], [0, 0, 1, 1], [], []>} : vector<8x64xbf16>, vector<64x8xbf16>, vector<8x8xf32> -> vector<8x8xf32>
    %cst_22 = arith.constant 1.250000e-01 : f32
    %69 = vector.broadcast %cst_22 : f32 to vector<8x8xf32>
    %70 = arith.mulf %68, %69 : vector<8x8xf32>
    %cst_23 = arith.constant -1.000000e+30 : f32
    %71 = vector.broadcast %cst_23 : f32 to vector<8x8xf32>
    %72 = arith.select %37, %70, %71 : vector<8x8xi1>, vector<8x8xf32>
    %cst_24 = arith.constant dense<0xFF800000> : vector<8xf32>
    %73 = vector.multi_reduction <maximumf>, %72, %cst_24 [1] : vector<8x8xf32> to vector<8xf32>
    %74 = vector.shape_cast %73 : vector<8xf32> to vector<8x1xf32>
    %75 = vector.broadcast %74 : vector<8x1xf32> to vector<8x8xf32>
    %76 = arith.subf %72, %75 : vector<8x8xf32>
    %77 = math.exp %76 : vector<8x8xf32>
    %cst_25 = arith.constant dense<0.000000e+00> : vector<8xf32>
    %78 = vector.multi_reduction <add>, %77, %cst_25 [1] : vector<8x8xf32> to vector<8xf32>
    %79 = vector.shape_cast %78 : vector<8xf32> to vector<8x1xf32>
    %80 = vector.broadcast %79 : vector<8x1xf32> to vector<8x8xf32>
    %81 = arith.divf %77, %80 : vector<8x8xf32>
    %82 = arith.truncf %81 : vector<8x8xf32> to vector<8x8xbf16>
    %cst_26 = arith.constant dense<0.000000e+00> : vector<8x64xf32>
    %83 = tpu.matmul %82, %66, %cst_26 {dimension_numbers = #tpu.dot_dimension_numbers<[1], [0], [0], [1], [0, 0, 1, 1], [], []>} : vector<8x8xbf16>, vector<8x64xbf16>, vector<8x64xf32> -> vector<8x64xf32>
    %84 = tpu.concatenate %60, %83 in 1 : vector<8x64xf32>, vector<8x64xf32> -> vector<8x128xf32>
    %85 = arith.truncf %84 : vector<8x128xf32> to vector<8x128xbf16>
    %c0_27 = arith.constant 0 : index
    %c0_28 = arith.constant 0 : index
    %86 = vector.load %arg6[%c0_27, %c0_28] : memref<128x128xbf16, #tpu.memory_space<vmem>>, vector<128x128xbf16>
    %cst_29 = arith.constant dense<0.000000e+00> : vector<8x128xf32>
    %87 = tpu.matmul %85, %86, %cst_29 {dimension_numbers = #tpu.dot_dimension_numbers<[1], [0], [0], [1], [0, 0, 1, 1], [], []>} : vector<8x128xbf16>, vector<128x128xbf16>, vector<8x128xf32> -> vector<8x128xf32>
    %c0_30 = arith.constant 0 : index
    %c0_31 = arith.constant 0 : index
    %88 = vector.load %arg7[%c0_30, %c0_31] : memref<1x128xf32, #tpu.memory_space<vmem>>, vector<1x128xf32>
    %89 = vector.broadcast %88 : vector<1x128xf32> to vector<8x128xf32>
    %90 = arith.addf %87, %89 : vector<8x128xf32>
    %91 = arith.addf %1, %90 : vector<8x128xf32>
    %c0_32 = arith.constant 0 : index
    %c0_33 = arith.constant 0 : index
    %c0_34 = arith.constant 0 : index
    %92 = vector.load %arg8[%c0_32, %c0_33, %c0_34] : memref<1x8x128xf32, #tpu.memory_space<vmem>>, vector<1x8x128xf32>
    %93 = vector.shape_cast %92 : vector<1x8x128xf32> to vector<8x128xf32>
    %94 = vector.shape_cast %91 : vector<8x128xf32> to vector<1x8x128xf32>
    tpu.vector_store %arg8[%c0_32, %c0_33, %c0_34], %94 {strides = array<i32>} : memref<1x8x128xf32, #tpu.memory_space<vmem>>, vector<1x8x128xf32>,
    return
  }
  func.func @transform_0(%arg0: i32) -> (i32, i32, i32) {
    %c0_i32 = arith.constant 0 : i32
    %c0_i32_0 = arith.constant 0 : i32
    %c0_i32_1 = arith.constant 0 : i32
    return %arg0, %c0_i32, %c0_i32_0 : i32, i32, i32
  }
  func.func @transform_1(%arg0: i32) -> (i32, i32) {
    %c0_i32 = arith.constant 0 : i32
    %c0_i32_0 = arith.constant 0 : i32
    %c0_i32_1 = arith.constant 0 : i32
    return %c0_i32, %c0_i32_0 : i32, i32
  }
  func.func @transform_2(%arg0: i32) -> (i32, i32) {
    %c0_i32 = arith.constant 0 : i32
    %c0_i32_0 = arith.constant 0 : i32
    %c0_i32_1 = arith.constant 0 : i32
    return %c0_i32, %c0_i32_0 : i32, i32
  }
  func.func @transform_3(%arg0: i32) -> (i32, i32) {
    %c0_i32 = arith.constant 0 : i32
    %c0_i32_0 = arith.constant 0 : i32
    %c0_i32_1 = arith.constant 0 : i32
    return %c0_i32, %c0_i32_0 : i32, i32
  }
  func.func @transform_4(%arg0: i32) -> (i32, i32) {
    %c0_i32 = arith.constant 0 : i32
    %c0_i32_0 = arith.constant 0 : i32
    %c0_i32_1 = arith.constant 0 : i32
    return %c0_i32, %c0_i32_0 : i32, i32
  }
  func.func @transform_5(%arg0: i32) -> (i32, i32) {
    %c0_i32 = arith.constant 0 : i32
    %c0_i32_0 = arith.constant 0 : i32
    %c0_i32_1 = arith.constant 0 : i32
    return %c0_i32, %c0_i32_0 : i32, i32
  }
  func.func @transform_6(%arg0: i32) -> (i32, i32) {
    %c0_i32 = arith.constant 0 : i32
    %c0_i32_0 = arith.constant 0 : i32
    %c0_i32_1 = arith.constant 0 : i32
    return %c0_i32, %c0_i32_0 : i32, i32
  }
  func.func @transform_7(%arg0: i32) -> (i32, i32, i32) {
    %c0_i32 = arith.constant 0 : i32
    %c0_i32_0 = arith.constant 0 : i32
    %c0_i32_1 = arith.constant 0 : i32
    return %arg0, %c0_i32, %c0_i32_0 : i32, i32, i32
  }
}

</mosaic_0001>

<bundles_post_ra>
// kernel: tpu_custom_call.1
= control target key start
LH: loop header
LB: loop body
LE: loop exit
PB: predicated region body
PF: predicated region fallthrough
CT: control target
= control target key end

     0   :  { %12 = vsyncpa [#allocation3], 0  ;;  %s1858_s0 = inlined_call_operand.hbm [shape: f32[2,8,128], index: 0, kind: input, shape index: {}]   ;;  %s1859_s1 = inlined_call_operand.vmem [shape: f32[1,128], index: 1, kind: input, shape index: {}]   ;;  %s1860_s2 = inlined_call_operand.vmem [shape: f32[1,128], index: 2, kind: input, shape index: {}]   ;;  %s1861_s3 = inlined_call_operand.hbm [shape: bf16[128,384], index: 3, kind: input, shape index: {}]   ;;  %s1862_s4 = inlined_call_operand.vmem [shape: f32[1,384], index: 4, kind: input, shape index: {}]   ;;  %s1863_s5 = inlined_call_operand.hbm [shape: bf16[128,128], index: 5, kind: input, shape index: {}]   ;;  %s1864_s6 = inlined_call_operand.vmem [shape: f32[1,128], index: 6, kind: input, shape index: {}]   ;;  %s1865_s7 = inlined_call_operand.hbm [shape: f32[2,8,128], index: 7, kind: output, shape index: {}]  }
   0x1   :  { %14 = vsyncpa [#allocation3 + $0x1], 0 }
   0x2   :  { %15 = vsyncpa [#allocation6], 0 }
   0x3   :  { %16 = vsyncpa [#allocation4], 0 }
   0x4   :  { %18 = vsyncpa [#allocation4 + $0x1], 0  ;;  %s1547_s24 = smov 0   ;;  %s1549_s25 = smov 0  }
   0x5   :  { %s1551_s26 = smov 0   ;;  %s1553_s27 = smov 0  }
   0x6 LB: > { %s1568_s28 = sadd.s32 4294967295, %s1493_s27   ;;  %s1067_s29 = sadd.s32 4294967294, %s1493_s27   ;;  %s1493_s27 = sphi %s1553_s27, %s1885_s27   ;;  %s1489_s26 = sphi %s1551_s26, %s1884_s26   ;;  %s1485_s25 = sphi %s1549_s25, %s1883_s25   ;;  %s1481_s24 = sphi %s1547_s24, %s1882_s24  }
   0x7   : > { %p44_p0 = scmp.ne.s32.totalorder %s1485_s25, %s1481_s24  ;;  %p1866_p1 = scmp.eq.s32.totalorder %s1568_s28, 0 }
   0x8   : > { %p200_p3 = scmp.eq.s32.totalorder %s1067_s29, 1  ;;  %p1068_p5 = scmp.ge.s32.totalorder %s1493_s27, 1 }
   0x9   : > { %p1577_p4 = por %p1866_p1, %p44_p0  ;;  %p207_p7 = scmp.lt.s32.totalorder %s1493_s27, 3 }
   0xa   : > { %p1582_p6 = por %p200_p3, %p44_p0  ;;  %s1495_s10 = smov [#allocation5]  }
   0xb   : > { %s1869_s30 = scalar_select %p1577_p4, 1, 0 }
   0xc   : > { %s1870_s8 = scalar_select %p1582_p6, 1, 0 }
   0xd   : > { %p1587_p8 = pnand %p1068_p5, %p207_p7  ;;  %s225_s11 = sshll.u32 %s1495_s10, 4  ;;  %s1591_s11 = int_to_ptr.vmem [resolvable:$true] %s225_s11 }
   0xe   : > { %s1496_s13 = smov [#allocation7]   ;;  %s1337_s17 = scalar_lea.hbm %s1861_s3, 3072 }
   0xf   : > { %p1224_p9 = pneg %p1587_p8  ;;  %s241_s14 = sshll.u32 %s1496_s13, 4  ;;  %s1602_s14 = int_to_ptr.vmem [resolvable:$true] %s241_s14 }
  0x10   : > { %p1338_p12 = scmp.ne.s32.totalorder %s1861_s3, %s1337_s17  ;;  %p1344_p5 = scmp.lt.u32.totalorder %s1337_s17, %s1861_s3 }
  0x11   : > { %p1598_p11 = pnand %p1224_p9, %p1866_p1 }
  0x13   : > { %p1339_p13 = pneg %p1598_p11 }
  0x15   : > { %p1340_p0 = pnand %p1339_p13, %p1338_p12 }
  0x17   : > { %p1341_p3 = pneg %p1340_p0 }
  0x19   : > { %p1346_p7 = pnand %p1344_p5, %p1341_p3 }
  0x1b   : > { %1349 = shalt.err (!%p1346_p7)
}
  0x1c   : > { %s1350_s22 = scalar_lea.vmem %s1591_s11, 3072  ;;  %p1358_p2 = scmp.lt.s32.totalorder %s1591_s11, %s1591_s11 }
  0x1d   : > { %p1351_p9 = scmp.ne.s32.totalorder %s1591_s11, %s1350_s22  ;;  %p1359_p12 = scmp.lt.s32.totalorder %s1350_s22, %s1350_s22 }
  0x1f   : > { %p1353_p10 = pnand %p1351_p9, %p1339_p13  ;;  %p1360_p0 = por %p1359_p12, %p1358_p2 }
  0x21   : > { %p1354_p1 = pneg %p1353_p10 }
  0x23   : > { %p1361_p6 = pnand %p1360_p0, %p1354_p1 }
  0x25   : > { %1364 = shalt.err (!%p1361_p6)
}
  0x26   : > { %s1497_s23 = smov 192   ;;  %s1498_s29 = smov 12  }
  0x27   : > { %1227 = dma.hbm_to_vmem [thread:$0]  (!%p1598_p11), %s1861_s3, 3072, %s1591_s11, [#allocation6], %s1497_s23, %s1497_s23, %s1498_s29  }
  0x28   : > { %s1365_s17 = scalar_lea.hbm %s1863_s5, 1024 }
  0x29   : > { %p1366_p2 = scmp.ne.s32.totalorder %s1863_s5, %s1365_s17  ;;  %p1372_p10 = scmp.lt.u32.totalorder %s1365_s17, %s1863_s5 }
  0x2b   : > { %p1368_p1 = pnand %p1366_p2, %p1339_p13 }
  0x2d   : > { %p1369_p6 = pneg %p1368_p1 }
  0x2f   : > { %p1374_p3 = pnand %p1372_p10, %p1369_p6 }
  0x31   : > { %1377 = shalt.err (!%p1374_p3)
}
  0x32   : > { %s1378_s11 = scalar_lea.vmem %s1602_s14, 1024  ;;  %p1386_p12 = scmp.lt.s32.totalorder %s1602_s14, %s1602_s14 }
  0x33   : > { %p1379_p5 = scmp.ne.s32.totalorder %s1602_s14, %s1378_s11  ;;  %p1387_p0 = scmp.lt.s32.totalorder %s1378_s11, %s1378_s11 }
  0x35   : > { %p1381_p7 = pnand %p1379_p5, %p1339_p13  ;;  %p1388_p2 = por %p1387_p0, %p1386_p12 }
  0x37   : > { %p1382_p9 = pneg %p1381_p7 }
  0x39   : > { %p1389_p1 = pnand %p1388_p2, %p1382_p9 }
  0x3b   : > { %1392 = shalt.err (!%p1389_p1)
}
  0x3c   : > { %s1499_s22 = smov 64   ;;  %s1500_s23 = smov 4  }
  0x3d   : > { %1230 = dma.hbm_to_vmem [thread:$0]  (!%p1598_p11), %s1863_s5, 1024, %s1602_s14, [#allocation6], %s1499_s22, %s1499_s22, %s1500_s23  }
  0x3e   : > { %s1657_s13 = sadd.s32 1, %s1493_s27   ;;  %s31_s16 = sadd.s32 1, %s1489_s26 }
  0x3f   : > { %s28_s15 = ssub.s32 %s1493_s27, %s1657_s13  ;;  %p38_p6 = scmp.ne.s32.totalorder %s1489_s26, %s1485_s25 }
  0x40   : > { %p29_p13 = scmp.eq.s32.totalorder %s28_s15, 0  ;;  %p39_p10 = scmp.eq.s32.totalorder %s1493_s27, 0 }
  0x41   : > { %p1873_p5 = scmp.eq.s32.totalorder %s1568_s28, 1  ;;  %p1241_p9 = scmp.lt.s32.totalorder %s1493_s27, 2 }
  0x42   : > { %s1666_s17 = scalar_select %p29_p13, %s1489_s26, %s31_s16  }
  0x43   : > { %p40_p3 = por %p39_p10, %p38_p6  ;;  %p1670_p7 = por %p1873_p5, %p38_p6 }
  0x44   : > { %s258_s12 = sand.u32 1, %s1489_s26   ;;  %s1073_s14 = sshll.u32 %s1493_s27, 7 }
  0x45   : > { %s1874_s18 = scalar_select %p1670_p7, 1, 0 }
  0x46   : > { %s1072_s19 = sshll.u32 %s258_s12, 3  ;;  %s1680_s11 = scalar_lea.hbm %s1858_s0, %s1073_s14 }
  0x47   : > { %s262_s22 = scalar_lea.vmem [#allocation2], %s1072_s19  ;;  %p1684_p11 = pnand %p1241_p9, %p40_p3 }
  0x48   : > { %s269_s23 = sshll.u32 %s262_s22, 4  ;;  %s259_s10 = scalar_lea.sflag [#allocation3], %s258_s12  ;;  %s1682_s23 = int_to_ptr.vmem [resolvable:$true] %s269_s23 }
  0x49   : > { %s1393_s15 = scalar_lea.hbm %s1680_s11, 128  ;;  %p1395_p0 = pneg %p1684_p11 }
  0x4a   : > { %p1394_p12 = scmp.ne.s32.totalorder %s1680_s11, %s1393_s15  ;;  %s1398_s14 = scalar_lea.hbm %s1858_s0, 256 }
  0x4b   : > { %p1399_p13 = scmp.lt.u32.totalorder %s1680_s11, %s1858_s0  ;;  %p1400_p6 = scmp.lt.u32.totalorder %s1398_s14, %s1393_s15 }
  0x4c   : > { %p1396_p2 = pnand %p1395_p0, %p1394_p12  ;;  %p1402_p3 = scmp.lt.u32.totalorder %s1393_s15, %s1680_s11 }
  0x4d   : > { %p1401_p10 = por %p1400_p6, %p1399_p13 }
  0x4e   : > { %p1397_p1 = pneg %p1396_p2 }
  0x4f   : > { %p1403_p5 = por %p1402_p3, %p1401_p10 }
  0x51   : > { %p1404_p9 = pnand %p1403_p5, %p1397_p1 }
  0x53   : > { %1407 = shalt.err (!%p1404_p9)
}
  0x54   : > { %s1408_s12 = scalar_lea.vmem %s1682_s23, 128  ;;  %s1501_s22 = smov [#allocation2]  }
  0x55   : > { %p1409_p12 = scmp.ne.s32.totalorder %s1682_s23, %s1408_s12  ;;  %s1413_s16 = sshll.u32 %s1501_s22, 4  ;;  %s1414_s16 = int_to_ptr.vmem [resolvable:$false] %s1413_s16 }
  0x56   : > { %s1415_s19 = scalar_lea.vmem %s1414_s16, 256  ;;  %p1416_p4 = scmp.lt.s32.totalorder %s1682_s23, %s1414_s16 }
  0x57   : > { %p1411_p2 = pnand %p1409_p12, %p1395_p0  ;;  %p1417_p13 = scmp.lt.s32.totalorder %s1415_s19, %s1408_s12 }
  0x59   : > { %p1412_p7 = pneg %p1411_p2  ;;  %p1418_p6 = por %p1417_p13, %p1416_p4 }
  0x5b   : > { %p1419_p10 = pnand %p1418_p6, %p1412_p7 }
  0x5d   : > { %1422 = shalt.err (!%p1419_p10)
}
  0x5e   : > { %1234 = dma.hbm_to_vmem [thread:$0]  (!%p1684_p11), %s1680_s11, 128, %s1682_s23, %s259_s10  }
  0x5f   : > { %278 = sbr.rel (%p1587_p8) target bundleno = 2133 (0x855), region = 48  ;;  %s1716_s15 = sand.u32 (!%p1587_p8), 1, %s1485_s25  }
  0x60   : > { %s1075_s14 = sshll.u32 (!%p1587_p8), %s1716_s15, 3  ;;  %s281_s20 = scalar_lea.sflag (!%p1587_p8), [#allocation3], %s1716_s15 }
  0x61   : > { %s284_s21 = scalar_lea.vmem (!%p1587_p8), [#allocation2], %s1075_s14  ;;  %p1876_p4 = scmp.ne.s32.totalorder (!%p1587_p8), %s1869_s30, 0 }
  0x66   : > { %1468 = dma.done.wait (%p1876_p4), %s281_s20, 128  }
  0x67   : > { %1470 = vsyncadd (%p1876_p4), %s281_s20, 4294967168  ;;  %p1877_p7 = scmp.eq.s32.totalorder %s1568_s28, 0 }
  0x69   : > { %1472 = dma.done.wait (%p1877_p7), [#allocation6], 4096   ;;  %p1878_p8 = pmov %p1877_p7 }
  0x6a   : > { %v1502_v0 = vmov 0.0   ;;  %v1731_v1 = vld [vmem:[%s284_s21] sm:$0xff]  ;;  %v1289_v4 = vld [vmem:[#allocation5] ss:$12 sps:$4 sm:$0xff]   ;;  %v1503_v22 = vmov 0   ;;  %vm1504_vm0 = vmmov 0   ;;  %v389_v43 = vlaneseq }
  0x6b   : > { %1474 = vsyncadd (%p1878_p8), [#allocation6], 4294963200  ;;  %1148 = vmatprep.subr.bf16.mxu1 %v1502_v0  ;;  %325 = vadd.xlane.f32.xlu0 %v1731_v1  ;;  %v328_v2 = vmul.f32 %v1731_v1, %v1731_v1  ;;  %v1287_v3 = vld [vmem:[#allocation5 + $0x4] ss:$12 sps:$4 sm:$0xff]   ;;  %v1290_v5 = vld [vmem:[#allocation5 + $0x8] ss:$12 sps:$4 sm:$0xff]  }
  0x6c   : > { %532 = vmatprep.subr.bf16.mxu0 %v1287_v3  ;;  %1149 = vmatpush3.bf16.msra.mxu1 %v1290_v5  ;;  %v1291_v6 = vld [vmem:[#allocation5 + $0x1c] ss:$12 sps:$4 sm:$0xff]   ;;  %v1293_v7 = vld [vmem:[#allocation5 + $0x18] ss:$12 sps:$4 sm:$0xff]   ;;  %v1294_v8 = vld [vmem:[#allocation5 + $0x20] ss:$12 sps:$4 sm:$0xff]  }
  0x6d   : > { %533 = vmatpush1.bf16.msra.mxu0 %v1289_v4  ;;  %1150 = vmatprep.subr.bf16.mxu1 %v1502_v0  ;;  %v1295_v9 = vld [vmem:[#allocation5 + $0x34] ss:$12 sps:$4 sm:$0xff]   ;;  %v1297_v10 = vld [vmem:[#allocation5 + $0x30] ss:$12 sps:$4 sm:$0xff]   ;;  %v1298_v11 = vld [vmem:[#allocation5 + $0x38] ss:$12 sps:$4 sm:$0xff]  }
  0x6e   : > { %534 = vmatprep.subr.bf16.mxu0 %v1291_v6  ;;  %v1299_v12 = vld [vmem:[#allocation5 + $0x4c] ss:$12 sps:$4 sm:$0xff]   ;;  %v1301_v13 = vld [vmem:[#allocation5 + $0x48] ss:$12 sps:$4 sm:$0xff]   ;;  %v1302_v14 = vld [vmem:[#allocation5 + $0x50] ss:$12 sps:$4 sm:$0xff]   ;;  %564 = vmatprep.mubr.bf16.mxu0 %v1503_v22 }
  0x6f   : > { %329 = vadd.xlane.f32.xlu0 %v328_v2  ;;  %v1303_v15 = vld [vmem:[#allocation5 + $0x64] ss:$12 sps:$4 sm:$0xff]   ;;  %v1305_v16 = vld [vmem:[#allocation5 + $0x60] ss:$12 sps:$4 sm:$0xff]   ;;  %v1306_v17 = vld [vmem:[#allocation5 + $0x68] ss:$12 sps:$4 sm:$0xff]   ;;  %1164 = vmatprep.mubr.msk.bf16.mxu1 %vm1504_vm0, %v1502_v0 }
  0x70   : > { %1151 = vmatpush3.bf16.msra.mxu1 %v1294_v8  ;;  %v1307_v18 = vld [vmem:[#allocation5 + $0x7c] ss:$12 sps:$4 sm:$0xff]   ;;  %v1309_v19 = vld [vmem:[#allocation5 + $0x78] ss:$12 sps:$4 sm:$0xff]   ;;  %v1310_v20 = vld [vmem:[#allocation5 + $0x80] ss:$12 sps:$4 sm:$0xff]  }
  0x71   : > { %535 = vmatpush1.bf16.msra.mxu0 %v1293_v7  ;;  %1152 = vmatprep.subr.bf16.mxu1 %v1502_v0  ;;  %v1311_v21 = vld [vmem:[#allocation5 + $0x94] ss:$12 sps:$4 sm:$0xff]   ;;  %v1313_v23 = vld [vmem:[#allocation5 + $0x90] ss:$12 sps:$4 sm:$0xff]   ;;  %v1314_v24 = vld [vmem:[#allocation5 + $0x98] ss:$12 sps:$4 sm:$0xff]  }
  0x72   : > { %536 = vmatprep.subr.bf16.mxu0 %v1295_v9  ;;  %v1315_v25 = vld [vmem:[#allocation5 + $0xac] ss:$12 sps:$4 sm:$0xff]   ;;  %v1317_v26 = vld [vmem:[#allocation5 + $0xa8] ss:$12 sps:$4 sm:$0xff]   ;;  %v1318_v27 = vld [vmem:[#allocation5 + $0xb0] ss:$12 sps:$4 sm:$0xff]  }
  0x73   : > { %v1079_v37 = vld [vmem:[%s1859_s1] ss:$0 sm:$0xff]  ;;  %v1758_v44 = vshrl.u32 %v389_v43, 7  ;;  %vm621_vm1 = vcmask 523264   ;;  %s1505_s12 = smov 64   ;;  %vm686_vm2 = vcmask 1043456  }
  0x74   : > { %1153 = vmatpush3.bf16.msra.mxu1 %v1298_v11  ;;  %v1080_v39 = vld [vmem:[%s1860_s2] ss:$0 sm:$0xff]  ;;  %v616_v6 = vand.u32 127, %v389_v43  ;;  %vm670_vm4 = vcmask 64512   ;;  %s1119_s19 = sshll.u32 %s1568_s28, 7  ;;  %s322_s20 = scalar_lea.vmem [#allocation8], %s1075_s14 }
  0x75   : > { %537 = vmatpush1.bf16.msra.mxu0 %v1297_v10  ;;  %1154 = vmatprep.subr.bf16.mxu1 %v1502_v0  ;;  %v395_v45 = vsub.s32 1, %v1758_v44  ;;  %v387_v46 = vld [vmem:[%s1862_s4] sm:$0x7]  ;;  %v399_v47 = vsub.s32 2, %v1758_v44  ;;  %v391_v49 = vsub.s32 0, %v1758_v44  ;;  %s978_s21 = sshll.u32 %s322_s20, 4  ;;  %s1814_s11 = scalar_lea.hbm %s1865_s7, %s1119_s19  ;;  %s1816_s21 = int_to_ptr.vmem [resolvable:$true] %s978_s21 }
  0x76   : > { %538 = vmatprep.subr.bf16.mxu0 %v1299_v12  ;;  %vm617_vm3 = vcmp.le.s32.totalorder %v616_v6, %v1758_v44  ;;  %s965_s28 = scalar_lea.sflag [#allocation4], %s1716_s15  ;;  %s1423_s14 = scalar_lea.vmem %s1816_s21, 128 }
  0x77   : > { %v396_v48 = vrot.slane %v387_v46, %v395_v45  ;;  %v400_v54 = vrot.slane %v387_v46, %v399_v47  ;;  %v392_v60 = vrot.slane %v387_v46, %v391_v49  ;;  %v1320_v49 = vld [vmem:[#allocation7 + $0x8] sm:$0xff]   ;;  %p1424_p11 = scmp.ne.s32.totalorder %s1816_s21, %s1423_s14  ;;  %p1879_p0 = scmp.ne.s32.totalorder %s1874_s18, 0 }
  0x78   : > { %1155 = vmatpush3.bf16.msra.mxu1 %v1302_v14  ;;  %s1506_s23 = smov [#allocation8]  }
  0x79   : > { %539 = vmatpush1.bf16.msra.mxu0 %v1301_v13  ;;  %1156 = vmatprep.subr.bf16.mxu1 %v1502_v0  ;;  %p1425_p1 = pnand %p1424_p11, %p1879_p0  ;;  %s1427_s29 = sshll.u32 %s1506_s23, 4  ;;  %s1428_s29 = int_to_ptr.vmem [resolvable:$false] %s1427_s29 }
  0x7a   : > { %540 = vmatprep.subr.bf16.mxu0 %v1303_v15  ;;  %s1429_s10 = scalar_lea.vmem %s1428_s29, 256  ;;  %p1430_p5 = scmp.lt.s32.totalorder %s1816_s21, %s1428_s29 }
  0x7b   : > { %p1426_p3 = pneg %p1425_p1  ;;  %p1431_p9 = scmp.lt.s32.totalorder %s1429_s10, %s1423_s14 }
  0x7c   : > { %1157 = vmatpush3.bf16.msra.mxu1 %v1306_v17 }
  0x7d   : > { %541 = vmatpush1.bf16.msra.mxu0 %v1305_v16  ;;  %1158 = vmatprep.subr.bf16.mxu1 %v1502_v0  ;;  %p1432_p12 = por %p1431_p9, %p1430_p5 }
  0x7e   : > { %542 = vmatprep.subr.bf16.mxu0 %v1307_v18 }
  0x7f   : > { %p1433_p2 = pnand %p1432_p12, %p1426_p3 }
  0x80   : > { %1159 = vmatpush3.bf16.msra.mxu1 %v1310_v20 }
  0x81   : > { %543 = vmatpush1.bf16.msra.mxu0 %v1309_v19  ;;  %1160 = vmatprep.subr.bf16.mxu1 %v1502_v0 }
  0x82   : > { %544 = vmatprep.subr.bf16.mxu0 %v1311_v21 }
  0x84   : > { %1161 = vmatpush3.bf16.msra.mxu1 %v1314_v24 }
  0x85   : > { %545 = vmatpush1.bf16.msra.mxu0 %v1313_v23  ;;  %1162 = vmatprep.subr.bf16.mxu1 %v1502_v0 }
  0x86   : > { %546 = vmatprep.subr.bf16.mxu0 %v1315_v25 }
  0x88   : > { %1163 = vmatpush3.bf16.msra.mxu1 %v1318_v27 }
  0x89   : > { %547 = vmatpush1.bf16.msra.mxu0 %v1317_v26  ;;  %1168 = vmatprep.subr.bf16.mxu1 %v1502_v0 }
  0x8a   : > { %1192 = vmatprep.subr.bf16.mxu0 %v1502_v0 }
  0xf8   : > { %v326_v28 = vpop.xlane.xlu0 %325 }
  0xf9   : > { %v327_v29 = vmul.f32 0.0078125, %v326_v28 }
  0xfb   : > { %v332_v31 = vmul.f32 %v327_v29, %v327_v29  ;;  %v334_v35 = vsub.f32 %v1731_v1, %v327_v29 }
  0xfc   : > { %v330_v30 = vpop.xlane.xlu0 %329 }
  0xfd   : > { %v331_v32 = vmul.f32 0.0078125, %v330_v30 }
  0xff   : > { %v333_v33 = vsub.f32 %v331_v32, %v332_v31 }
 0x101   : > { %v335_v34 = vadd.f32 1e-05, %v333_v33 }
 0x103   : > { %1327 = vrsqrt.f32 %v335_v34 }
 0x10d   : > { %v1328_v36 = vpop.eup %1327 }
 0x10e   : > { %v337_v38 = vmul.f32 %v1328_v36, %v334_v35 }
 0x110   : > { %v345_v40 = vmul.f32 %v1079_v37, %v337_v38 }
 0x112   : > { %v353_v41 = vadd.f32 %v1080_v39, %v345_v40 }
 0x114   : > { %v354_v42 = vpack.c.bf16 %v353_v41, %v353_v41 }
 0x116   : > { %565 = vmatmul.mubr.bf16.vlgmr.msra.gmra.mrb[0].mxu0 %v354_v42  ;;  %1165 = vmatmul.mubr.bf16.vlgmr.msra.gmra.mrb[0].mxu1 %v354_v42 }
 0x117   : > { %1170 = vmatprep.mubr.msk.bf16.mxu1 %vm1504_vm0, %v1502_v0  ;;  %1208 = vmatprep.mubr.msk.bf16.mxu0 %vm1504_vm0, %v1502_v0 }
 0x1e9   : > { %v566_v50 = vpop.f32.mrb[0].mxu0  ;;  %v607_v51 = vpop.f32.mrb[0].mxu1 }
 0x1ea   : > { %v568_v52 = vpop.f32.mrb[1].mxu0  ;;  %v1166_v53 = vpop.f32.mrb[1].mxu1  ;;  %v608_v62 = vadd.f32 %v607_v51, %v400_v54  ;;  %v567_v2 = vadd.f32 %v566_v50, %v392_v60  ;;  %v1321_v50 = vld [vmem:[#allocation7 + $0x10] sm:$0xff]   ;;  %v1322_v51 = vld [vmem:[#allocation7 + $0x18] sm:$0xff]  }
 0x1eb   : > { %v569_v55 = vadd.f32 %v568_v52, %v396_v48  ;;  %v570_v56 = vpop.f32.mrb[2].mxu0  ;;  %v610_v57 = vpop.f32.mrb[2].mxu1  ;;  %v1319_v48 = vld [vmem:[#allocation7] sm:$0xff]   ;;  %v1324_v53 = vld [vmem:[#allocation7 + $0x28] sm:$0xff]   ;;  %v1325_v54 = vld [vmem:[#allocation7 + $0x30] sm:$0xff]  }
 0x1ec   : > { %v571_v58 = vpop.f32.mrb[3].mxu0  ;;  %v1167_v59 = vpop.f32.mrb[3].mxu1  ;;  %v620_v3 = vpack.c.bf16 %v608_v62, %v608_v62  ;;  %v618_v4 = vpack.c.bf16 %v567_v2, %v567_v2  ;;  %1193 = vmatpush3.bf16.msra.mxu0 %v1319_v48  ;;  %v1323_v52 = vld [vmem:[#allocation7 + $0x20] sm:$0xff]  }
 0x1ed   : > { %v619_v61 = vpack.c.bf16 %v569_v55, %v569_v55  ;;  %1194 = vmatprep.subr.bf16.mxu0 %v1502_v0  ;;  %v1326_v55 = vld [vmem:[#allocation7 + $0x38] sm:$0xff]  }
 0x1ee   : > { %v688_v5 = vsel %vm686_vm2, %v620_v3, 0 }
 0x1ef   : > { %v626_v63 = vsel %vm621_vm1, %v619_v61, 0  ;;  %734 = vrot.lane.b32.xlu0 %v619_v61, %s1505_s12 }
 0x1f0   : > { %1169 = vmatpush3.bf16.xpose.msra.mxu1 %v626_v63  ;;  %1195 = vmatpush3.bf16.msra.mxu0 %v1320_v49  ;;  %v1109_v63 = vld [vmem:[%s1864_s6] ss:$0 sm:$0xff] }
 0x1f1   : > { %1174 = vmatprep.subr.bf16.mxu1 %v1502_v0  ;;  %1196 = vmatprep.subr.bf16.mxu0 %v1502_v0 }
 0x1f4   : > { %1197 = vmatpush3.bf16.msra.mxu0 %v1321_v50 }
 0x1f5   : > { %1198 = vmatprep.subr.bf16.mxu0 %v1502_v0 }
 0x1f7   : > { %1171 = vmatmul.mubr.msk.bf16.vlgmr.msra.gmra.mrb[4].mxu1 %vm621_vm1, %v618_v4 }
 0x1f8   : > { %1175 = vmatpush3.bf16.msra.mxu1 %v688_v5  ;;  %1176 = vmatprep.mubr.msk.bf16.mxu1 %vm1504_vm0, %v1502_v0 }
 0x1f9   : > { %1180 = vmatprep.subr.bf16.mxu1 %v1502_v0  ;;  %1199 = vmatpush3.bf16.msra.mxu0 %v1322_v51 }
 0x1fa   : > { %1200 = vmatprep.subr.bf16.mxu0 %v1502_v0 }
 0x1fd   : > { %1201 = vmatpush3.bf16.msra.mxu0 %v1323_v52 }
 0x1fe   : > { %1202 = vmatprep.subr.bf16.mxu0 %v1502_v0 }
 0x201   : > { %1203 = vmatpush3.bf16.msra.mxu0 %v1324_v53 }
 0x202   : > { %1204 = vmatprep.subr.bf16.mxu0 %v1502_v0 }
 0x205   : > { %1205 = vmatpush3.bf16.msra.mxu0 %v1325_v54 }
 0x206   : > { %1206 = vmatprep.subr.bf16.mxu0 %v1502_v0 }
 0x209   : > { %1207 = vmatpush3.bf16.msra.mxu0 %v1326_v55 }
 0x261   : > { %v735_v22 = vpop.permute.xlu0 %734 }
 0x262   : > { %v740_v24 = vsel %vm621_vm1, %v735_v22, 0 }
 0x2ca   : > { %v662_v7 = vpop.f32.mrb[4].mxu1 }
 0x2cb   : > { %v668_v8 = vmul.f32 0.125, %v662_v7  ;;  %v1172_v9 = vpop.f32.mrb[5].mxu1 }
 0x2cc   : > { %v665_v10 = vpop.f32.mrb[6].mxu1 }
 0x2cd   : > { %v1173_v11 = vpop.f32.mrb[7].mxu1  ;;  %v669_v12 = vsel %vm617_vm3, %v668_v8, -1e+30 }
 0x2ce   : > { %v671_v13 = vsel %vm670_vm4, %v669_v12, -inf }
 0x2cf   : > { %672 = vmax.xlane.f32.xlu1 %v671_v13 }
 0x35c   : > { %v673_v14 = vpop.xlane.xlu1 %672 }
 0x35d   : > { %v674_v15 = vsub.f32 %v669_v12, %v673_v14 }
 0x35f   : > { %v675_v16 = vmul.f32 1.442695, %v674_v15 }
 0x361   : > { %1329 = vpow2.f32 %v675_v16 }
 0x36b   : > { %v1330_v17 = vpop.eup %1329 }
 0x36c   : > { %v677_v18 = vsel %vm670_vm4, %v1330_v17, 0.0 }
 0x36d   : > { %678 = vadd.xlane.f32.xlu1 %v677_v18 }
 0x37e   : > { %731 = vrot.lane.b32.xlu1 %v618_v4, %s1505_s12 }
 0x3fa   : > { %v679_v19 = vpop.xlane.xlu1 %678 }
 0x3fb   : > { %1331 = vrcp.f32 %v679_v19 }
 0x3fe   : > { %v732_v25 = vpop.permute.xlu1 %731 }
 0x405   : > { %v1332_v20 = vpop.eup %1331 }
 0x406   : > { %v681_v21 = vmul.f32 %v1332_v20, %v1330_v17 }
 0x408   : > { %v682_v23 = vpack.c.bf16 %v681_v21, %v681_v21 }
 0x40a   : > { %1177 = vmatmul.mubr.msk.bf16.vlgmr.msra.gmra.mrb[8].mxu1 %vm670_vm4, %v682_v23 }
 0x40b   : > { %1181 = vmatpush3.bf16.xpose.msra.mxu1 %v740_v24  ;;  %1182 = vmatprep.mubr.msk.bf16.mxu1 %vm1504_vm0, %v1502_v0 }
 0x40c   : > { %1186 = vmatprep.subr.bf16.mxu1 %v1502_v0 }
 0x412   : > { %1183 = vmatmul.mubr.msk.bf16.vlgmr.msra.gmra.mrb[12].mxu1 %vm621_vm1, %v732_v25 }
 0x413   : > { %1188 = vmatprep.mubr.msk.bf16.mxu1 %vm1504_vm0, %v1502_v0 }
 0x4dd   : > { %v724_v26 = vpop.f32.mrb[8].mxu1 }
 0x4de   : > { %v1178_v27 = vpop.f32.mrb[9].mxu1 }
 0x4df   : > { %v727_v28 = vpop.f32.mrb[10].mxu1 }
 0x4e0   : > { %v1179_v29 = vpop.f32.mrb[11].mxu1 }
 0x4e5   : > { %v776_v30 = vpop.f32.mrb[12].mxu1 }
 0x4e6   : > { %v782_v31 = vmul.f32 0.125, %v776_v30  ;;  %v1184_v32 = vpop.f32.mrb[13].mxu1 }
 0x4e7   : > { %v779_v33 = vpop.f32.mrb[14].mxu1 }
 0x4e8   : > { %v1185_v34 = vpop.f32.mrb[15].mxu1  ;;  %v783_v35 = vsel %vm617_vm3, %v782_v31, -1e+30 }
 0x4e9   : > { %v784_v36 = vsel %vm670_vm4, %v783_v35, -inf }
 0x4ea   : > { %785 = vmax.xlane.f32.xlu1 %v784_v36 }
 0x577   : > { %v786_v37 = vpop.xlane.xlu1 %785 }
 0x578   : > { %v787_v38 = vsub.f32 %v783_v35, %v786_v37 }
 0x57a   : > { %v788_v39 = vmul.f32 1.442695, %v787_v38 }
 0x57c   : > { %1333 = vpow2.f32 %v788_v39 }
 0x586   : > { %v1334_v40 = vpop.eup %1333 }
 0x587   : > { %v790_v41 = vsel %vm670_vm4, %v1334_v40, 0.0 }
 0x588   : > { %791 = vadd.xlane.f32.xlu0 %v790_v41 }
 0x59e   : > { %797 = vrot.lane.b32.xlu0 %v620_v3, %s1505_s12 }
 0x615   : > { %v792_v42 = vpop.xlane.xlu0 %791 }
 0x616   : > { %1335 = vrcp.f32 %v792_v42 }
 0x619   : > { %v798_v43 = vpop.permute.xlu0 %797 }
 0x61a   : > { %v803_v45 = vsel %vm686_vm2, %v798_v43, 0 }
 0x61b   : > { %1187 = vmatpush3.bf16.msra.mxu1 %v803_v45 }
 0x620   : > { %v1336_v44 = vpop.eup %1335 }
 0x621   : > { %v794_v46 = vmul.f32 %v1336_v44, %v1334_v40 }
 0x623   : > { %v795_v47 = vpack.c.bf16 %v794_v46, %v794_v46 }
 0x625   : > { %1189 = vmatmul.mubr.msk.bf16.vlgmr.msra.gmra.mrb[16].mxu1 %vm670_vm4, %v795_v47 }
 0x6f8   : > { %v839_v56 = vpop.f32.mrb[16].mxu1 }
 0x6f9   : > { %846 = vrot.lane.b32.xlu1 %v839_v56, %s1505_s12  ;;  %v1190_v57 = vpop.f32.mrb[17].mxu1 }
 0x6fa   : > { %v842_v58 = vpop.f32.mrb[18].mxu1 }
 0x6fb   : > { %v1191_v59 = vpop.f32.mrb[19].mxu1 }
 0x76b   : > { %v847_v60 = vpop.permute.xlu1 %846 }
 0x76c   : > { %v849_v61 = vsel %vm621_vm1, %v724_v26, %v847_v60 }
 0x76d   : > { %v850_v62 = vpack.c.bf16 %v849_v61, %v849_v61 }
 0x76f   : > { %1209 = vmatmul.mubr.bf16.vlgmr.msra.gmra.mrb[4].mxu0 %v850_v62 }
 0x842   : > { %v956_v0 = vpop.f32.mrb[4].mxu0 }
 0x843   : > { %v957_v2 = vadd.f32 %v1109_v63, %v956_v0  ;;  %v1210_v3 = vpop.f32.mrb[5].mxu0 }
 0x844   : > { %v959_v4 = vpop.f32.mrb[6].mxu0 }
 0x845   : > { %v962_v5 = vadd.f32 %v957_v2, %v1731_v1  ;;  %v1211_v6 = vpop.f32.mrb[7].mxu0 }
 0x847   : > { %963 = vst [vmem:[%s322_s20] sm:$0xff] %v962_v5 }
 0x848   : > { %1436 = shalt.err (!%p1433_p2)
}
 0x849   : > { %s1437_s15 = scalar_lea.hbm %s1814_s11, 128  ;;  %s1441_s16 = scalar_lea.hbm %s1865_s7, 256 }
 0x84a   : > { %p1438_p13 = scmp.ne.s32.totalorder %s1814_s11, %s1437_s15  ;;  %p1442_p4 = scmp.lt.u32.totalorder %s1814_s11, %s1865_s7 }
 0x84b   : > { %p1443_p7 = scmp.lt.u32.totalorder %s1441_s16, %s1437_s15  ;;  %p1445_p11 = scmp.lt.u32.totalorder %s1437_s15, %s1814_s11 }
 0x84c   : > { %p1439_p6 = pnand %p1438_p13, %p1879_p0 }
 0x84d   : > { %p1444_p8 = por %p1443_p7, %p1442_p4 }
 0x84e   : > { %p1440_p10 = pneg %p1439_p6 }
 0x84f   : > { %p1446_p1 = por %p1445_p11, %p1444_p8 }
 0x851   : > { %p1447_p3 = pnand %p1446_p1, %p1440_p10 }
 0x853   : > { %1450 = shalt.err (!%p1447_p3)
}
 0x854   : > { %1222 = dma.vmem_to_hbm [thread:$0]  (%p1879_p0), %s1816_s21, 128, %s1814_s11, %s965_s28  }
 0x855 PF: > { %s990_s30 = sand.u32 1, %s1481_s24   ;;  %p1880_p5 = scmp.ne.s32.totalorder %s1870_s8, 0 }
 0x856   : > { %p1881_p9 = scmp.ge.s32.totalorder %s1493_s27, 2  ;;  %s991_s9 = scalar_lea.sflag [#allocation4], %s990_s30 }
 0x858   : > { %p1236_p12 = pnand %p1881_p9, %p1880_p5 }
 0x85a   : > { %1476 = dma.done.wait (!%p1236_p12), %s991_s9, 128  }
 0x85b   : > { %1478 = vsyncadd (!%p1236_p12), %s991_s9, 4294967168  ;;  %p21_p2 = scmp.ge.s32.totalorder %s1657_s13, 4   ;;  %s1882_s24 = smov %s1485_s25 }
 0x85c   : > { %s1883_s25 = smov %s1489_s26  ;;  %s1884_s26 = smov %s1666_s17 }
 0x85d   : > { %s1885_s27 = smov %s1657_s13  ;;  %23 = sbr.rel (!%p21_p2) target bundleno = 6 (0x6), region = 101 }
 0x864   :  { %996 = vsyncpa [#allocation3], 1 }
 0x865   :  { %998 = vsyncpa [#allocation3 + $0x1], 1 }
 0x866   :  { %999 = vsyncpa [#allocation6], 1 }
 0x867   :  { %1000 = vsyncpa [#allocation4], 1 }
 0x868   :  { %1002 = vsyncpa [#allocation4 + $0x1], 1 }

</bundles_post_ra>
